<compile_context>
chip_gen: v5e
topology: v5e:2x2
jax: 0.10.0
libtpu: 0.0.40
codegen_flags: <defaults>
</compile_context>

<pallas_src>
import functools

import jax
import jax.numpy as jnp
from jax import lax
from jax.experimental import pallas as pl
from jax.experimental.pallas import tpu as pltpu


# ----------------------------------------------------------------------------
# Kernel 1: farthest point sampling over the flattened point cloud.
# ----------------------------------------------------------------------------
def _fps_kernel(coords_ref, pts_ref, idx_ref, *, num_valid, num_groups):
    # coords_ref: (3 * Mpad,) f32 SMEM   [x_0..x_{Mpad-1}, y_0.., z_0..]
    # pts_ref   : (8, Mpad)   f32 VMEM   rows 0..2 = x, y, z (rest zero)
    # idx_ref   : (G,)        i32 SMEM   selected flat-cloud indices (output)
    m_pad = pts_ref.shape[1]

    # Hoisted lane-dense coordinate rows (loaded once, live in vregs).
    px = pts_ref[0:1, :]                                      # (1, Mpad)
    py = pts_ref[1:2, :]
    pz = pts_ref[2:3, :]

    # Padded lanes start at -inf so the argmax never selects them.
    lane_ids = lax.broadcasted_iota(jnp.int32, (1, m_pad), 1)
    mind0 = jnp.where(lane_ids < num_valid,
                      jnp.float32(jnp.inf), jnp.float32(-jnp.inf))

    # TODO(synk): torch_cluster.fps defaults to a random start point; we use a
    # deterministic start (flat index 0) since this is a synthetic kernel.
    idx_ref[0] = jnp.int32(0)

    def body(g, carry):
        last_idx, mind = carry
        # O(1) scalar reads of the previously selected point's coordinates.
        sx = coords_ref[last_idx]
        sy = coords_ref[m_pad + last_idx]
        sz = coords_ref[2 * m_pad + last_idx]
        # Lane-dense distance update: pure VPU work on (1, Mpad).
        d = (px - sx) ** 2 + (py - sy) ** 2 + (pz - sz) ** 2
        mind = jnp.minimum(mind, d)
        nxt = jnp.argmax(mind, axis=-1)[0].astype(jnp.int32)
        idx_ref[g] = nxt
        return nxt, mind

    # G-1 iterations: one distance update + one argmax each (no wasted pass).
    lax.fori_loop(1, num_groups, body, (jnp.int32(0), mind0))


def fps_indices(points_flat, group_num):
    """points_flat: (M, 3) f32 -> (group_num,) int32 indices into the flat cloud."""
    M = points_flat.shape[0]
    m_pad = ((M + 127) // 128) * 128
    pts = points_flat.astype(jnp.float32)

    # Lane-major VMEM copy: coords on sublanes, points on lanes.
    pts_lane = jnp.zeros((8, m_pad), jnp.float32).at[:3, :M].set(pts.T)
    # Flattened SMEM copy used for O(1) scalar selection of the current point.
    coords_flat = pts_lane[:3].reshape(-1)                    # (3 * Mpad,)

    kernel = functools.partial(_fps_kernel, num_valid=M, num_groups=group_num)
    return pl.pallas_call(
        kernel,
        out_shape=jax.ShapeDtypeStruct((group_num,), jnp.int32),
        in_specs=[
            pl.BlockSpec(memory_space=pltpu.MemorySpace.SMEM),
            pl.BlockSpec(memory_space=pltpu.MemorySpace.VMEM),
        ],
        out_specs=pl.BlockSpec(memory_space=pltpu.MemorySpace.SMEM),
    )(coords_flat, pts_lane)


# ----------------------------------------------------------------------------
# Kernel 2: kNN — squared pairwise distances + iterative k-smallest argmin.
# ----------------------------------------------------------------------------
def _knn_kernel(q_ref, pt_ref, idx_ref, *, k):
    # q_ref  : (1, S, 8)  query points (lc_xyz, zero-padded coord dim)
    # pt_ref : (1, 8, N)  all points, lane-major (coords on sublanes)
    # idx_ref: (1, k, S)  int32 neighbor indices, lane-dense per-neighbor rows
    q = q_ref[0].astype(jnp.float32)                          # (S, 8)
    pt = pt_ref[0].astype(jnp.float32)                        # (8, N)

    qq = jnp.sum(q * q, axis=-1, keepdims=True)               # (S, 1)
    pp = jnp.sum(pt * pt, axis=0, keepdims=True)              # (1, N) lane-dense
    # MXU matmul with the natural (S, C) x (C, N) contraction (no p.T relayout).
    cross = lax.dot_general(q, pt, (((1,), (0,)), ((), ())),
                            preferred_element_type=jnp.float32)  # (S, N)
    # dist = |q|^2 + |p|^2 - 2 q.p^T   (same as square_distance)
    dist = qq + pp - 2.0 * cross                              # (S, N)

    S, N = dist.shape
    col_ids = lax.broadcasted_iota(jnp.int32, (S, N), 1)
    # TODO(synk): for production sizes (S, N large) dist should be tiled over N
    # with a running k-best merge to fit v7x's 64 MiB VMEM and keep the argmin
    # cross-lane reduces chunk-local; demo shapes are tiny so one tile suffices.
    for j in range(k):                                        # static unroll, k small
        am = jnp.argmin(dist, axis=-1).astype(jnp.int32)      # (S,)
        idx_ref[0, j:j + 1, :] = am[None, :]                  # full-S row store
        dist = jnp.where(col_ids == am[:, None], jnp.inf, dist)


def knn_indices(new_xyz_p, xyz_t, k):
    """new_xyz_p: (B, S, 8), xyz_t: (B, 8, N) -> (B, S, k) int32 neighbor indices."""
    B, S, Cp = new_xyz_p.shape
    _, _, N = xyz_t.shape
    idx_t = pl.pallas_call(
        functools.partial(_knn_kernel, k=k),
        out_shape=jax.ShapeDtypeStruct((B, k, S), jnp.int32),
        grid=(B,),
        in_specs=[
            pl.BlockSpec((1, S, Cp), lambda b: (b, 0, 0)),
            pl.BlockSpec((1, Cp, N), lambda b: (b, 0, 0)),
        ],
        out_specs=pl.BlockSpec((1, k, S), lambda b: (b, 0, 0)),
        compiler_params=pltpu.CompilerParams(
            dimension_semantics=("parallel",)),
    )(new_xyz_p, xyz_t)
    # Lane-dense (B, k, S) kernel output -> reference (B, S, k) layout.
    return jnp.transpose(idx_t, (0, 2, 1))


# ----------------------------------------------------------------------------
# Module wrapper (glue in plain JAX).
# ----------------------------------------------------------------------------
def _index_points(points, idx):
    """points: (B, N, C), idx: (B, S, K) -> (B, S, K, C)  (== torch index_points)."""
    return jnp.take_along_axis(points[:, None, :, :], idx[..., None], axis=2)


class FPS_kNN:
    """No learnable parameters — just group_num / k_neighbors hyperparameters."""

    def __init__(self, group_num, k_neighbors):
        self.group_num = group_num
        self.k_neighbors = k_neighbors

    def __call__(self, xyz, x):
        B, N, _ = xyz.shape
        G = self.group_num
        Cx = x.shape[-1]

        flat_xyz = xyz.reshape(-1, 3).astype(jnp.float32)
        fps_idx = fps_indices(flat_xyz, G)                    # (G,) flat-cloud indices

        # Reference offsets the same flat indices by b*N per batch (may exceed
        # B*N; jnp.take clamps where torch would raise).
        batch_off = jnp.arange(B, dtype=jnp.int32)[:, None] * N
        idx_full = (fps_idx[None, :] + batch_off).reshape(-1)     # (B*G,)

        lc_xyz = jnp.take(flat_xyz, idx_full, axis=0).reshape(B, G, 3)
        lc_x = jnp.take(x.reshape(-1, Cx), idx_full, axis=0).reshape(B, G, Cx)

        # Layout plumbing for the kNN kernel: pad query coords to 8 lanes and
        # pre-transpose xyz to (B, 8, N) so points lie on lanes inside the kernel.
        lc_xyz_p = jnp.pad(lc_xyz, ((0, 0), (0, 0), (0, 5)))      # (B, G, 8)
        xyz_t = jnp.pad(jnp.transpose(xyz.astype(jnp.float32), (0, 2, 1)),
                        ((0, 0), (0, 5), (0, 0)))                 # (B, 8, N)

        knn_idx = knn_indices(lc_xyz_p, xyz_t, self.k_neighbors)  # (B, G, K)
        knn_xyz = _index_points(xyz, knn_idx)                     # (B, G, K, 3)
        knn_x = _index_points(x, knn_idx)                         # (B, G, K, Cx)
        return lc_xyz, lc_x, knn_xyz, knn_x


# ----------------------------------------------------------------------------
if __name__ == "__main__":
    key = jax.random.PRNGKey(0)
    kxyz, kx = jax.random.split(key)

    B, N = 2, 64          # points per cloud
    C_feat = 32           # feature channels of x
    group_num = 16
    k_neighbors = 8

    xyz = jax.random.normal(kxyz, (B, N, 3), dtype=jnp.float32)
    x = jax.random.normal(kx, (B, N, C_feat), dtype=jnp.float32)

    module = FPS_kNN(group_num, k_neighbors)
    lc_xyz, lc_x, knn_xyz, knn_x = module(xyz, x)
    jax.block_until_ready((lc_xyz, lc_x, knn_xyz, knn_x))

    assert lc_xyz.shape == (B, group_num, 3)
    assert lc_x.shape == (B, group_num, C_feat)
    assert knn_xyz.shape == (B, group_num, k_neighbors, 3)
    assert knn_x.shape == (B, group_num, k_neighbors, C_feat)

    print("KERNEL_OK")
</pallas_src>

<mosaic_0001>
module attributes {stable_mosaic.version = 11 : i64} {
  func.func @_fps_kernel(%arg0: memref<384xf32, #tpu.memory_space<smem>>, %arg1: memref<8x128xf32, #tpu.memory_space<vmem>>, %arg2: memref<16xi32, #tpu.memory_space<smem>>) attributes {dimension_semantics = [], scalar_prefetch = 0 : i64, scratch_operands = 0 : i64, tpu.core_type = #tpu.core_type<tc>} {
    %c0 = arith.constant 0 : index
    %c0_0 = arith.constant 0 : index
    %0 = vector.load %arg1[%c0, %c0_0] : memref<8x128xf32, #tpu.memory_space<vmem>>, vector<1x128xf32>
    %c1 = arith.constant 1 : index
    %c0_1 = arith.constant 0 : index
    %1 = vector.load %arg1[%c1, %c0_1] : memref<8x128xf32, #tpu.memory_space<vmem>>, vector<1x128xf32>
    %c2 = arith.constant 2 : index
    %c0_2 = arith.constant 0 : index
    %2 = vector.load %arg1[%c2, %c0_2] : memref<8x128xf32, #tpu.memory_space<vmem>>, vector<1x128xf32>
    %3 = tpu.iota {dimensions = array<i32: 1>} : vector<1x128xi32>
    %c128_i32 = arith.constant 128 : i32
    %4 = vector.broadcast %c128_i32 : i32 to vector<1x128xi32>
    %5 = arith.cmpi slt, %3, %4 : vector<1x128xi32>
    %cst = arith.constant 0x7F800000 : f32
    %cst_3 = arith.constant 0xFF800000 : f32
    %6 = vector.broadcast %cst : f32 to vector<1x128xf32>
    %7 = vector.broadcast %cst_3 : f32 to vector<1x128xf32>
    %8 = arith.select %5, %6, %7 : vector<1x128xi1>, vector<1x128xf32>
    %c0_i32 = arith.constant 0 : i32
    %c0_4 = arith.constant 0 : index
    %9 = memref.load %arg2[%c0_4] : memref<16xi32, #tpu.memory_space<smem>>
    memref.store %c0_i32, %arg2[%c0_4] : memref<16xi32, #tpu.memory_space<smem>>
    %c0_i32_5 = arith.constant 0 : i32
    %c1_i32 = arith.constant 1 : i32
    %c15_i32 = arith.constant 15 : i32
    %10 = arith.addi %c1_i32, %c15_i32 : i32
    %c1_i32_6 = arith.constant 1 : i32
    %11:2 = scf.for %arg3 = %c1_i32 to %10 step %c1_i32_6 iter_args(%arg4 = %c0_i32_5, %arg5 = %8) -> (i32, vector<1x128xf32>)  : i32 {
      %12 = arith.index_cast %arg4 : i32 to index
      %13 = memref.load %arg0[%12] : memref<384xf32, #tpu.memory_space<smem>>
      %c128_i32_8 = arith.constant 128 : i32
      %14 = arith.addi %c128_i32_8, %arg4 : i32
      %15 = arith.index_cast %14 : i32 to index
      %16 = memref.load %arg0[%15] : memref<384xf32, #tpu.memory_space<smem>>
      %c256_i32 = arith.constant 256 : i32
      %17 = arith.addi %c256_i32, %arg4 : i32
      %18 = arith.index_cast %17 : i32 to index
      %19 = memref.load %arg0[%18] : memref<384xf32, #tpu.memory_space<smem>>
      %20 = vector.broadcast %13 : f32 to vector<1x128xf32>
      %21 = arith.subf %0, %20 : vector<1x128xf32>
      %22 = arith.mulf %21, %21 : vector<1x128xf32>
      %23 = vector.broadcast %16 : f32 to vector<1x128xf32>
      %24 = arith.subf %1, %23 : vector<1x128xf32>
      %25 = arith.mulf %24, %24 : vector<1x128xf32>
      %26 = arith.addf %22, %25 : vector<1x128xf32>
      %27 = vector.broadcast %19 : f32 to vector<1x128xf32>
      %28 = arith.subf %2, %27 : vector<1x128xf32>
      %29 = arith.mulf %28, %28 : vector<1x128xf32>
      %30 = arith.addf %26, %29 : vector<1x128xf32>
      %31 = arith.minimumf %arg5, %30 : vector<1x128xf32>
      %32 = tpu.reduce_index %31 {axis = 1 : i32, kind = #tpu.reduction_kind<arg_max>} : vector<1x128xf32> -> vector<1xi32>
      %33 = vector.extract %32[0] : i32 from vector<1xi32>
      %34 = arith.index_cast %arg3 : i32 to index
      %35 = memref.load %arg2[%34] : memref<16xi32, #tpu.memory_space<smem>>
      memref.store %33, %arg2[%34] : memref<16xi32, #tpu.memory_space<smem>>
      scf.yield %33, %31 : i32, vector<1x128xf32>
    }
    %c15_i32_7 = arith.constant 15 : i32
    return
  }
}

</mosaic_0001>

<bundles_post_ra>
// kernel: tpu_custom_call.1
= control target key start
LH: loop header
LB: loop body
LE: loop exit
PB: predicated region body
PF: predicated region fallthrough
CT: control target
= control target key end

     0   :  { %7 = vsyncpa [#allocation4], 0  ;;  %s259_s0 = inlined_call_operand.hbm [shape: f32[384], index: 0, kind: input, shape index: {}]   ;;  %s260_s1 = inlined_call_operand.hbm [shape: f32[8,128], index: 1, kind: input, shape index: {}]   ;;  %s261_s2 = inlined_call_operand.hbm [shape: s32[16], index: 2, kind: output, shape index: {}]  }
   0x1   :  { %8 = vsyncpa [#allocation3], 0 }
   0x2   :  { %9 = vsyncpa [#allocation5], 0  ;;  %s15_s11 = sshll.u32 %s259_s0, 4  ;;  %s24_s14 = sshll.u32 %s260_s1, 4  ;;  %s16_s11 = int_to_ptr.hbm [resolvable:$true] %s15_s11  ;;  %s25_s14 = int_to_ptr.hbm [resolvable:$true] %s24_s14 }
   0x3   :  { %s217_s15 = smov [#allocation2]   ;;  %s218_s16 = smov [#allocation6]  }
   0x4   :  { %18 = dma.hbm_to_smem %s16_s11, 48, %s217_s15, [#allocation4]  }
   0x5   :  { %s26_s17 = sshll.u32 %s218_s16, 4  ;;  %s27_s17 = int_to_ptr.vmem [resolvable:$true] %s26_s17 }
   0x6   :  { %29 = dma.hbm_to_vmem [thread:$0]  %s25_s14, 128, %s27_s17, [#allocation3]  }
   0x7   :  { %199 = dma.done.wait [#allocation4], 48  }
   0x8   :  { %200 = vsyncadd [#allocation4], 4294967248 }
   0x9   :  { %201 = dma.done.wait [#allocation3], 128  }
   0xa   :  { %202 = vsyncadd [#allocation3], 4294967168 }
   0xb   :  { %38 = sfence }
   0xc   :  { %v39_v0 = vld [vmem:[#allocation6] sm:$0x1]  ;;  %v40_v1 = vld [vmem:[#allocation6 + $0x1] sm:$0x1]  ;;  %v41_v2 = vld [vmem:[#allocation6 + $0x2] sm:$0x1] }
   0xd   :  { %s219_s0 = smov 0   ;;  %v205_v3 = vmov inf   ;;  %s242_s18 = smov 0  }
   0xe   :  { %47 = sst [smem:[#allocation7]] %s219_s0  ;;  %s244_s1 = smov 1  }
   0xf LB: > { %s56_s19 = sld [smem:[#allocation2 + %s211_s18]]  ;;  %s57_s20 = sadd.s32 128, %s211_s18  ;;  %vm73_vm0 = vcmask 1040384   ;;  %s215_s1 = sphi %s244_s1, %s53_s1   ;;  %s211_s18 = sphi %s242_s18, %s110_s18   ;;  %v207_v3 = vphi %v205_v3, %v72_v3  }
  0x10   : > { %s58_s21 = sld [smem:[#allocation2 + %s57_s20]]  ;;  %s59_s22 = sadd.s32 256, %s211_s18 }
  0x11   : > { %s60_s23 = sld [smem:[#allocation2 + %s59_s22]]  ;;  %s78_s24 = scalar_lea.smem [#allocation7], %s215_s1 }
  0x12   : > { %s53_s1 = sadd.s32 1, %s215_s1  }
  0x13   : > { %p50_p0 = scmp.ge.s32.totalorder %s53_s1, 16  }
  0x14   :  { %s85_s27 = sshll.u32 (%p50_p0), %s261_s2, 4  ;;  %s220_s28 = smov (%p50_p0), [#allocation7]   ;;  %s86_s27 = int_to_ptr.hbm [resolvable:$true] %s85_s27 }
  0x15   : > { %v61_v4 = vstv %s56_s19 }
  0x16   : > { %v62_v5 = vsub.f32 %v39_v0, %v61_v4  ;;  %v64_v6 = vstv %s58_s21 }
  0x17   : > { %v65_v7 = vsub.f32 %v40_v1, %v64_v6  ;;  %v68_v8 = vstv %s60_s23 }
  0x18   : > { %v63_v9 = vmul.f32 %v62_v5, %v62_v5  ;;  %v69_v10 = vsub.f32 %v41_v2, %v68_v8 }
  0x19   : > { %v66_v11 = vmul.f32 %v65_v7, %v65_v7 }
  0x1a   : > { %v70_v12 = vmul.f32 %v69_v10, %v69_v10 }
  0x1b   : > { %v67_v13 = vadd.f32 %v66_v11, %v63_v9 }
  0x1d   : > { %v71_v14 = vadd.f32 %v70_v12, %v67_v13 }
  0x1f   : > { %v72_v3 = vmin.f32 %v207_v3, %v71_v14  }
  0x21   : > { %v74_v15 = vsel %vm73_vm0, %v72_v3, -inf }
  0x22   : > { %75 = vmax.index.xlane.f32.xlu0 %v74_v15 }
  0x95   : > { %v76_v16 = vpop.xlane.xlu0 %75 }
  0x96   : > { %109 = vpush %v76_v16 }
  0xc4   :  { %52 = sbr.rel (!%p50_p0) target bundleno = 15 (0xf), region = 45 }
  0xc7   : > { %s110_s18 = spop %109  }
  0xc8   : > { %79 = sst [smem:[%s78_s24]] %s110_s18 }
  0xc9   :  { %88 = dma.smem_to_hbm %s220_s28, 16, %s86_s27, [#allocation5]  }
  0xca   :  { %203 = dma.done.wait [#allocation5], 16  }
  0xcb   :  { %204 = vsyncadd [#allocation5], 4294967280 }
  0xcc   :  { %93 = sfence }
  0xcd   :  { %94 = vsyncpa [#allocation3], 1 }
  0xce   :  { %95 = vsyncpa [#allocation4], 1 }
  0xcf   :  { %96 = vsyncpa [#allocation5], 1 }

</bundles_post_ra>
